<compile_context>
chip_gen: v7x
topology: tpu7x:2x2x1
jax: 0.10.0
libtpu: 0.0.40
codegen_flags: <defaults>
</compile_context>

<pallas_src>
import jax
import jax.numpy as jnp
from jax.experimental import pallas as pl
from jax.experimental.pallas import tpu as pltpu


def _round_up(v, m):
    return -(-v // m) * m


def _cdiv(a, b):
    return -(-a // b)


# ----------------------------------------------------------------------------
# Kernel
# ----------------------------------------------------------------------------
def _label_kernel(x_ref, w_ref, b_ref, o_ref):
    # x_ref: (TB, H)   w_ref: (H, E_pad)   b_ref: (1, E_pad) f32   o_ref: (TB, E_pad)
    # Dropout(p=0.1) in eval mode == identity, so x feeds the MXU directly.
    # In-kernel cast of x to the weight's compute dtype (VPU work, hidden
    # under the x DMA) — no wrapper-side astype / extra HBM round trip.
    x = x_ref[...].astype(w_ref.dtype)
    acc = jnp.dot(x, w_ref[...], preferred_element_type=jnp.float32)
    # Bias epilogue stays f32 regardless of operand dtype.
    o_ref[...] = (acc + b_ref[...]).astype(o_ref.dtype)


# ----------------------------------------------------------------------------
# Parameter preparation (call ONCE at init, not per forward call)
# ----------------------------------------------------------------------------
def prepare_label_params(weight, bias, compute_dtype=None):
    """Pad / cast / transpose the nn.Linear params once.

    weight: [emotion, hidden] (PyTorch nn.Linear convention)
    bias:   [emotion]
    Returns (w_t, b_row):
      w_t:   [hidden, E_pad]  compute_dtype (emotion rows zero-padded to 128k)
      b_row: [1, E_pad]       float32
    """
    E, H = weight.shape
    if compute_dtype is None:
        compute_dtype = weight.dtype
    E_pad = _round_up(max(E, 128), 128)

    w_p = weight
    if E_pad != E:
        w_p = jnp.pad(w_p, ((0, E_pad - E), (0, 0)))
    # One-time transpose so the kernel runs a plain (M,K)x(K,N) matmul.
    w_t = jnp.transpose(w_p).astype(compute_dtype)          # [H, E_pad]

    b_p = bias.astype(jnp.float32)
    if E_pad != E:
        b_p = jnp.pad(b_p, ((0, E_pad - E),))
    b_row = b_p.reshape(1, E_pad)
    return w_t, b_row


# ----------------------------------------------------------------------------
# Batch-tile selection (>= 2 grid steps when possible, VMEM-budget aware)
# ----------------------------------------------------------------------------
def _select_batch_tile(B, H, E_pad, x_itemsize, w_itemsize, out_itemsize,
                       block_batch):
    if B <= 8:
        return B  # single tile equal to the full batch dim (always legal)
    B8 = _round_up(B, 8)
    # Aim for at least 2 grid steps (pipelining everywhere; megacore on v7x),
    # targeting ~block_batch rows per step.
    n_steps = max(2, _cdiv(B8, block_batch))
    tb = _round_up(_cdiv(B8, n_steps), 8)

    # Conservative VMEM budget: stay under v7x's 32 MiB default scoped limit
    # (x double-buffer + W double-buffer + output double-buffer).
    budget = 24 * 1024 * 1024
    resident = 2 * H * E_pad * w_itemsize + 2 * E_pad * 4
    avail = max(budget - resident, 1 << 20)
    per_row = 2 * H * x_itemsize + 2 * E_pad * out_itemsize
    tb_cap = max((avail // per_row) // 8 * 8, 8)

    tb = min(tb, tb_cap, B8)
    return max(tb, 8)


# ----------------------------------------------------------------------------
# Forward
# ----------------------------------------------------------------------------
def label_forward(x, w_t, b_row, emotion_size, *, block_batch=512):
    """logits = dropout(x, eval) @ W^T + b  via a single Pallas kernel.

    x:     [batch, hidden]  (hidden on the lane axis)
    w_t:   [hidden, E_pad]  from prepare_label_params
    b_row: [1, E_pad]       from prepare_label_params
    Returns [batch, emotion_size] in x.dtype.
    """
    out_dtype = x.dtype
    B, H = x.shape
    Hw, E_pad = w_t.shape
    assert Hw == H, "hidden dims of x and prepared weight must match"

    x_itemsize = jnp.dtype(x.dtype).itemsize
    w_itemsize = jnp.dtype(w_t.dtype).itemsize
    out_itemsize = jnp.dtype(out_dtype).itemsize

    TB = _select_batch_tile(B, H, E_pad, x_itemsize, w_itemsize, out_itemsize,
                            block_batch)
    grid = (_cdiv(B, TB),)  # ragged last block handled by Pallas (masked store)

    cost = pl.CostEstimate(
        flops=2 * B * H * E_pad,
        transcendentals=0,
        bytes_accessed=(
            B * H * x_itemsize            # x read (once, original dtype)
            + H * E_pad * w_itemsize      # W read (VMEM-resident, read once)
            + E_pad * 4                   # bias read
            + B * E_pad * out_itemsize    # logits write
        ),
    )

    out = pl.pallas_call(
        _label_kernel,
        out_shape=jax.ShapeDtypeStruct((B, E_pad), out_dtype),
        grid_spec=pltpu.PrefetchScalarGridSpec(
            num_scalar_prefetch=0,
            grid=grid,
            in_specs=[
                pl.BlockSpec((TB, H), lambda i: (i, 0)),       # x: tiled over batch
                pl.BlockSpec((H, E_pad), lambda i: (0, 0)),    # W: VMEM-resident
                pl.BlockSpec((1, E_pad), lambda i: (0, 0)),    # bias: VMEM-resident
            ],
            out_specs=pl.BlockSpec((TB, E_pad), lambda i: (i, 0)),
        ),
        compiler_params=pltpu.CompilerParams(
            # Batch tiles are independent -> shardable across v7x's 2 TCs.
            dimension_semantics=("parallel",),
        ),
        cost_estimate=cost,
    )(x, w_t, b_row)

    # Only the cheap column trim happens here; rows are already exactly B.
    return out[:, :emotion_size]


def primary_encoder_v2_no_pooler_for_con_forward(x, weight, bias, *,
                                                 compute_dtype=None,
                                                 block_batch=512):
    """Convenience wrapper matching the PyTorch module's forward().

    For repeated calls, hoist prepare_label_params() out of the hot loop.
    """
    w_t, b_row = prepare_label_params(weight, bias, compute_dtype)
    return label_forward(x, w_t, b_row, weight.shape[0],
                         block_batch=block_batch)


# ----------------------------------------------------------------------------
# Self-test
# ----------------------------------------------------------------------------
if __name__ == "__main__":
    key = jax.random.PRNGKey(0)
    kx, kw, kb, kx2 = jax.random.split(key, 4)

    # Small shapes consistent with forward():
    #   pooled_supcon_fea_cls: [batch, hidden_size] -> logits: [batch, emotion_size]
    batch, hidden_size, emotion_size = 4, 32, 8

    x = jax.random.normal(kx, (batch, hidden_size), dtype=jnp.float32)
    weight = jax.random.normal(kw, (emotion_size, hidden_size),
                               dtype=jnp.float32) * 0.02
    bias = jax.random.normal(kb, (emotion_size,), dtype=jnp.float32) * 0.02

    # Parameter prep hoisted (one-time), then the forward kernel.
    w_t, b_row = prepare_label_params(weight, bias)

    out = label_forward(x, w_t, b_row, emotion_size)
    out = jax.block_until_ready(out)

    ref = x @ weight.T + bias
    assert out.shape == (batch, emotion_size)
    assert jnp.allclose(out, ref, atol=1e-5, rtol=1e-5)

    # Second case: batch not a multiple of the tile -> exercises the
    # cdiv-grid / ragged last block path (>= 2 grid steps).
    batch2 = 20
    x2 = jax.random.normal(kx2, (batch2, hidden_size), dtype=jnp.float32)
    out2 = jax.block_until_ready(label_forward(x2, w_t, b_row, emotion_size))
    ref2 = x2 @ weight.T + bias
    assert out2.shape == (batch2, emotion_size)
    assert jnp.allclose(out2, ref2, atol=1e-5, rtol=1e-5)

    print("KERNEL_OK")
</pallas_src>

<mosaic_0001>
module attributes {stable_mosaic.version = 11 : i64} {
  func.func @_label_kernel(%arg0: i32, %arg1: memref<4x32xf32, #tpu.memory_space<vmem>>, %arg2: memref<32x128xf32, #tpu.memory_space<vmem>>, %arg3: memref<1x128xf32, #tpu.memory_space<vmem>>, %arg4: memref<4x128xf32, #tpu.memory_space<vmem>>) attributes {dimension_semantics = [#tpu.dimension_semantics<parallel>], iteration_bounds = array<i64: 1>, scalar_prefetch = 0 : i64, scratch_operands = 0 : i64, tpu.core_type = #tpu.core_type<tc>, window_params = [{transform_indices = @transform_0, window_bounds = array<i64: 4, 32>}, {pipeline_mode = #tpu.pipeline_mode<synchronous>, transform_indices = @transform_1, window_bounds = array<i64: 32, 128>}, {pipeline_mode = #tpu.pipeline_mode<synchronous>, transform_indices = @transform_2, window_bounds = array<i64: 1, 128>}, {transform_indices = @transform_3, window_bounds = array<i64: 4, 128>}]} {
    %c0 = arith.constant 0 : index
    %c0_0 = arith.constant 0 : index
    %0 = vector.load %arg1[%c0, %c0_0] : memref<4x32xf32, #tpu.memory_space<vmem>>, vector<4x32xf32>
    %c0_1 = arith.constant 0 : index
    %c0_2 = arith.constant 0 : index
    %1 = vector.load %arg2[%c0_1, %c0_2] : memref<32x128xf32, #tpu.memory_space<vmem>>, vector<32x128xf32>
    %cst = arith.constant dense<0.000000e+00> : vector<4x128xf32>
    %2 = tpu.matmul %0, %1, %cst {dimension_numbers = #tpu.dot_dimension_numbers<[1], [0], [0], [1], [0, 0, 1, 1], [], []>} : vector<4x32xf32>, vector<32x128xf32>, vector<4x128xf32> -> vector<4x128xf32>
    %c0_3 = arith.constant 0 : index
    %c0_4 = arith.constant 0 : index
    %3 = vector.load %arg3[%c0_3, %c0_4] : memref<1x128xf32, #tpu.memory_space<vmem>>, vector<1x128xf32>
    %4 = vector.broadcast %3 : vector<1x128xf32> to vector<4x128xf32>
    %5 = arith.addf %2, %4 : vector<4x128xf32>
    %c0_5 = arith.constant 0 : index
    %c0_6 = arith.constant 0 : index
    %6 = vector.load %arg4[%c0_5, %c0_6] : memref<4x128xf32, #tpu.memory_space<vmem>>, vector<4x128xf32>
    tpu.vector_store %arg4[%c0_5, %c0_6], %5 {strides = array<i32>} : memref<4x128xf32, #tpu.memory_space<vmem>>, vector<4x128xf32>,
    return
  }
  func.func @transform_0(%arg0: i32) -> (i32, i32) {
    %c0_i32 = arith.constant 0 : i32
    %c0_i32_0 = arith.constant 0 : i32
    return %arg0, %c0_i32 : i32, i32
  }
  func.func @transform_1(%arg0: i32) -> (i32, i32) {
    %c0_i32 = arith.constant 0 : i32
    %c0_i32_0 = arith.constant 0 : i32
    %c0_i32_1 = arith.constant 0 : i32
    return %c0_i32, %c0_i32_0 : i32, i32
  }
  func.func @transform_2(%arg0: i32) -> (i32, i32) {
    %c0_i32 = arith.constant 0 : i32
    %c0_i32_0 = arith.constant 0 : i32
    %c0_i32_1 = arith.constant 0 : i32
    return %c0_i32, %c0_i32_0 : i32, i32
  }
  func.func @transform_3(%arg0: i32) -> (i32, i32) {
    %c0_i32 = arith.constant 0 : i32
    %c0_i32_0 = arith.constant 0 : i32
    return %arg0, %c0_i32 : i32, i32
  }
}

</mosaic_0001>

<bundles_post_ra>
// kernel: tpu_custom_call.1
= control target key start
LH: loop header
LB: loop body
LE: loop exit
PB: predicated region body
PF: predicated region fallthrough
CT: control target
= control target key end

     0   :  { %8 = vsyncpa [#allocation3], 0  ;;  %s322_s0 = inlined_call_operand.hbm [shape: f32[4,32], index: 0, kind: input, shape index: {}]   ;;  %s323_s1 = inlined_call_operand.hbm [shape: f32[32,128], index: 1, kind: input, shape index: {}]   ;;  %s324_s2 = inlined_call_operand.vmem [shape: f32[1,128], index: 2, kind: input, shape index: {}]   ;;  %s325_s3 = inlined_call_operand.hbm [shape: f32[4,128], index: 3, kind: output, shape index: {}]  }
   0x1   :  { %9 = vsyncpa [#allocation6], 0 }
   0x2   :  { %10 = vsyncpa [#allocation4], 0  ;;  %s248_s12 = smov [#allocation2]   ;;  %s249_s14 = smov [#allocation5]  }
   0x3   :  { %s17_s13 = sshll.u32 %s248_s12, 4  ;;  %s26_s15 = sshll.u32 %s249_s14, 4  ;;  %s18_s13 = int_to_ptr.vmem [resolvable:$true] %s17_s13  ;;  %s276_s15 = int_to_ptr.vmem [resolvable:$true] %s26_s15 }
   0x4   :  { %s176_s18 = scalar_lea.hbm %s322_s0, 64 }
   0x5   :  { %p177_p0 = scmp.ne.s32.totalorder %s322_s0, %s176_s18  ;;  %p180_p1 = scmp.lt.u32.totalorder %s176_s18, %s322_s0 }
   0x7   :  { %p182_p2 = pnand %p180_p1, %p177_p0 }
   0x9   :  { %185 = shalt.err (!%p182_p2)
}
   0xa   :  { %s186_s23 = scalar_lea.vmem %s18_s13, 64  ;;  %p191_p4 = scmp.lt.s32.totalorder %s18_s13, %s18_s13 }
   0xb   :  { %p187_p3 = scmp.ne.s32.totalorder %s18_s13, %s186_s23  ;;  %p192_p5 = scmp.lt.s32.totalorder %s186_s23, %s186_s23 }
   0xd   :  { %p193_p6 = por %p192_p5, %p191_p4 }
   0xf   :  { %p194_p7 = pnand %p193_p6, %p187_p3 }
  0x11   :  { %197 = shalt.err (!%p194_p7)
}
  0x12   :  { %20 = dma.hbm_to_vmem [thread:$0]  %s322_s0, 64, %s18_s13, [#allocation3]  }
  0x13   :  { %s198_s28 = scalar_lea.hbm %s323_s1, 512 }
  0x14   :  { %p199_p8 = scmp.ne.s32.totalorder %s323_s1, %s198_s28  ;;  %p202_p9 = scmp.lt.u32.totalorder %s198_s28, %s323_s1 }
  0x16   :  { %p204_p10 = pnand %p202_p9, %p199_p8 }
  0x18   :  { %207 = shalt.err (!%p204_p10)
}
  0x19   :  { %s208_s6 = scalar_lea.vmem %s276_s15, 512  ;;  %p213_p12 = scmp.lt.s32.totalorder %s276_s15, %s276_s15 }
  0x1a   :  { %p209_p11 = scmp.ne.s32.totalorder %s276_s15, %s208_s6  ;;  %p214_p13 = scmp.lt.s32.totalorder %s208_s6, %s208_s6 }
  0x1c   :  { %p215_p0 = por %p214_p13, %p213_p12 }
  0x1e   :  { %p216_p1 = pnand %p215_p0, %p209_p11 }
  0x20   :  { %219 = shalt.err (!%p216_p1)
}
  0x21   :  { %s250_s0 = smov 128   ;;  %s251_s7 = smov 8  }
  0x22   :  { %32 = dma.hbm_to_vmem [thread:$0]  %s323_s1, 512, %s276_s15, [#allocation6], %s250_s0, %s250_s0, %s251_s7  }
  0x23   :  { %242 = dma.done.wait [#allocation3], 64  }
  0x24   :  { %243 = vsyncadd [#allocation3], 4294967232 }
  0x25   :  { %244 = dma.done.wait [#allocation6], 512  }
  0x26   :  { %245 = vsyncadd [#allocation6], 4294966784  ;;  %v252_v0 = vmov 0.0|0.0   ;;  %vm253_vm0 = vmmov 0   ;;  %v254_v1 = vmov 0.0   ;;  %v42_v2 = vld [vmem:[#allocation5] sm:$0xff] }
  0x27   :  { %162 = vmatprep.subr.bf16.mxu0 %v252_v0  ;;  %159 = vmatprep.mubr.msk.f32.mxu0 %vm253_vm0, %v254_v1  ;;  %v43_v3 = vld [vmem:[#allocation5 + $0x8] sm:$0xff]  ;;  %v44_v4 = vld [vmem:[#allocation5 + $0x10] sm:$0xff]  ;;  %v45_v6 = vld [vmem:[#allocation5 + $0x18] sm:$0xff]  ;;  %vm53_vm1 = vcmask 261120   ;;  %s255_s11 = smov [#allocation7]  }
  0x28   :  { %v163_v5 = vpack.c.bf16 %v43_v3, %v42_v2  ;;  %v166_v7 = vpack.c.bf16 %v45_v6, %v44_v4  ;;  %v41_v8 = vld [vmem:[#allocation2] sm:$0xf]  ;;  %s134_s12 = sshll.u32 %s255_s11, 4  ;;  %s135_s12 = int_to_ptr.vmem [resolvable:$true] %s134_s12 }
  0x29   :  { %v144_v9 = vld [vmem:[%s324_s2] ss:$0 sm:$0xff]  ;;  %s220_s13 = scalar_lea.vmem %s135_s12, 64  ;;  %p225_p3 = scmp.lt.s32.totalorder %s135_s12, %s135_s12 }
  0x2a   :  { %164 = vmatpush3.bf16.msra.mxu0 %v163_v5  ;;  %p221_p2 = scmp.ne.s32.totalorder %s135_s12, %s220_s13  ;;  %p226_p4 = scmp.lt.s32.totalorder %s220_s13, %s220_s13 }
  0x2b   :  { %165 = vmatprep.subr.bf16.mxu0 %v252_v0 }
  0x2c   :  { %p227_p5 = por %p226_p4, %p225_p3 }
  0x2e   :  { %167 = vmatpush3.bf16.msra.mxu0 %v166_v7  ;;  %p228_p6 = pnand %p227_p5, %p221_p2 }
  0x31   :  { %160 = vmatmul.mubr.msk.f32.vlgmr.msra.gmra.mrb[0].mxu0 %vm53_vm1, %v41_v8 }
 0x104   :  { %v123_v10 = vpop.f32.mrb[0].mxu0 }
 0x105   :  { %v124_v11 = vadd.f32 %v144_v9, %v123_v10  ;;  %v161_v12 = vpop.f32.mrb[1].mxu0 }
 0x107   :  { %127 = vst [vmem:[#allocation7] sm:$0xf] %v124_v11 }
 0x108   :  { %231 = shalt.err (!%p228_p6)
}
 0x109   :  { %s232_s16 = scalar_lea.hbm %s325_s3, 64 }
 0x10a   :  { %p233_p7 = scmp.ne.s32.totalorder %s325_s3, %s232_s16  ;;  %p236_p8 = scmp.lt.u32.totalorder %s232_s16, %s325_s3 }
 0x10c   :  { %p238_p9 = pnand %p236_p8, %p233_p7 }
 0x10e   :  { %241 = shalt.err (!%p238_p9)
}
 0x10f   :  { %137 = dma.vmem_to_hbm [thread:$0]  %s135_s12, 64, %s325_s3, [#allocation4]  }
 0x110   :  { %246 = dma.done.wait [#allocation4], 64  }
 0x111   :  { %247 = vsyncadd [#allocation4], 4294967232 }
 0x112   :  { %141 = vsyncpa [#allocation3], 1 }
 0x113   :  { %142 = vsyncpa [#allocation6], 1 }
 0x114   :  { %143 = vsyncpa [#allocation4], 1 }

</bundles_post_ra>
